<compile_context>
chip_gen: v6e
topology: v6e:2x2x1
jax: 0.10.0
libtpu: 0.0.40
codegen_flags: <defaults>
</compile_context>

<pallas_src>
import functools

import jax
import jax.numpy as jnp
from jax.experimental import pallas as pl
from jax.experimental.pallas import tpu as pltpu


def _asp_kernel(x_ref, w_ref, b_ref, out_ref, l_scr, s1_scr, s2_scr,
                *, inv_t, t_len, t_tile, n_chan, needs_mask):
    """Processes one (bb, tt, C) tile of x; streaming accumulation over the T grid axis."""
    t = pl.program_id(1)

    @pl.when(t == 0)
    def _init():
        l_scr[...] = jnp.zeros(l_scr.shape, dtype=jnp.float32)
        s1_scr[...] = jnp.zeros(s1_scr.shape, dtype=jnp.float32)
        s2_scr[...] = jnp.zeros(s2_scr.shape, dtype=jnp.float32)

    x = x_ref[...].astype(jnp.float32)       # (bb, tt, C); bf16 input upcast on load
    w = w_ref[...].astype(jnp.float32)       # (1, C)   broadcasts along lanes
    b = b_ref[...].astype(jnp.float32)       # (1, 1)

    # Fused attention scores: tanh(x @ (W^T v) + b.v) -> (bb, tt, 1).
    scores = jnp.tanh(jnp.sum(x * w, axis=2, keepdims=True) + b)

    # tanh-bounded scores => exp cannot overflow; no running-max / rescale path.
    p = jnp.exp(scores)                                             # (bb, tt, 1)
    if needs_mask:
        t_idx = t * t_tile + jax.lax.broadcasted_iota(jnp.int32, p.shape, 1)
        p = jnp.where(t_idx < t_len, p, 0.0)                        # zero padded rows

    px = p * x                                                      # (bb, tt, C)
    l_scr[...] += jnp.sum(p, axis=1, keepdims=True)                 # (bb, 1, 1)
    s1_scr[...] += jnp.sum(px, axis=1, keepdims=True)               # (bb, 1, C)
    s2_scr[...] += jnp.sum(px * x, axis=1, keepdims=True)           # (bb, 1, C)

    @pl.when(t == pl.num_programs(1) - 1)
    def _finalize():
        inv_l = 1.0 / l_scr[...]                    # exact divide: runs once per batch block
        mean = s1_scr[...] * (inv_l * inv_t)        # (bb, 1, C) == mean_T(attn * x)
        var = s2_scr[...] * inv_l - mean * mean     # sum_T(attn*x*x) - mean^2 (as in module)
        out_ref[:, :, 0:n_chan] = mean.astype(out_ref.dtype)
        out_ref[:, :, n_chan:2 * n_chan] = var.astype(out_ref.dtype)


def _vmem_budgets():
    """(per-buffer x-tile budget, scoped VMEM limit) derived per TPU generation."""
    try:
        vmem_cap = getattr(pltpu.get_tpu_info(), "vmem_capacity_bytes", None)
    except Exception:
        vmem_cap = None
    if vmem_cap is None:
        vmem_cap = 64 * 1024 * 1024                     # assume the smallest (v7x)
    if vmem_cap >= 100 * 1024 * 1024:                   # v5e / v6e: 128 MiB physical VMEM
        return 14 * 1024 * 1024, 64 * 1024 * 1024
    return 10 * 1024 * 1024, 48 * 1024 * 1024           # v7x: 64 MiB physical VMEM


def _largest_divisor_leq(n, cap):
    cap = max(1, min(n, cap))
    for d in range(cap, 0, -1):
        if n % d == 0:
            return d
    return 1


def attentive_stat_pool(x, w_proj, b_proj, v, *, batch_block_cap=8, time_tile_cap=2048):
    """x: (B, T, C); w_proj: (E, C); b_proj: (E,); v: (E,)  ->  (B, 2C) float32."""
    B, T, C = x.shape

    # Algebraic fusion of the attention projection (tanh is applied after it).
    w_eff = jnp.einsum("ec,e->c", w_proj, v).astype(jnp.float32).reshape(1, C)
    b_eff = jnp.dot(b_proj, v).astype(jnp.float32).reshape(1, 1)

    # Batch block: keep >= 2 blocks on the parallel grid axis when possible (v7x megacore).
    bb = _largest_divisor_leq(B, batch_block_cap)
    if B >= 2 and B // bb < 2:
        bb = _largest_divisor_leq(B, B // 2)

    # Time tile: largest multiple of 8 fitting the per-buffer VMEM budget (and the cap).
    x_tile_bytes, vmem_limit = _vmem_budgets()
    row_bytes = bb * C * x.dtype.itemsize
    tt_cap = max(8, min((time_tile_cap // 8) * 8,
                        (x_tile_bytes // max(1, row_bytes)) // 8 * 8))
    if T <= tt_cap:
        tt = -(-T // 8) * 8                 # single tile, minimally padded
    else:
        tt = tt_cap
    t_pad = -(-T // tt) * tt
    needs_mask = t_pad != T
    if needs_mask:
        x = jnp.pad(x, ((0, 0), (0, t_pad - T), (0, 0)))   # padded rows masked in-kernel

    kernel = functools.partial(_asp_kernel, inv_t=1.0 / T, t_len=T, t_tile=tt,
                               n_chan=C, needs_mask=needs_mask)

    cost = pl.CostEstimate(
        flops=int(6 * B * t_pad * C),
        transcendentals=int(2 * B * t_pad),
        bytes_accessed=int(B * t_pad * C * x.dtype.itemsize + B * 2 * C * 4),
    )

    out = pl.pallas_call(
        kernel,
        out_shape=jax.ShapeDtypeStruct((B, 1, 2 * C), jnp.float32),
        grid_spec=pltpu.PrefetchScalarGridSpec(
            num_scalar_prefetch=0,
            grid=(B // bb, t_pad // tt),
            in_specs=[
                pl.BlockSpec((bb, tt, C), lambda b, t: (b, t, 0)),   # x tile (streamed)
                pl.BlockSpec((1, C), lambda b, t: (0, 0)),           # w_eff = W^T v
                pl.BlockSpec((1, 1), lambda b, t: (0, 0)),           # b_eff = b . v
            ],
            out_specs=pl.BlockSpec((bb, 1, 2 * C), lambda b, t: (b, 0, 0)),  # [mean | var]
            scratch_shapes=[
                pltpu.VMEM((bb, 1, 1), jnp.float32),   # running softmax denominator
                pltpu.VMEM((bb, 1, C), jnp.float32),   # running sum attn*x
                pltpu.VMEM((bb, 1, C), jnp.float32),   # running sum attn*x*x
            ],
        ),
        compiler_params=pltpu.CompilerParams(
            dimension_semantics=("parallel", "arbitrary"),
            vmem_limit_bytes=vmem_limit,
        ),
        cost_estimate=cost,
    )(x, w_eff, b_eff)

    return out[:, 0, :]                      # (B, 2C); squeeze of a size-1 dim is free


def reference(x, w_proj, b_proj, v):
    """Pure-JAX reference mirroring the PyTorch module exactly (unfused math)."""
    lin = jnp.einsum("btc,ec->bte", x, w_proj) + b_proj              # (B, T, E)
    scores = jnp.tanh(jnp.einsum("bte,e->bt", lin, v))               # (B, T)
    attn_w = jax.nn.softmax(scores, axis=1)                          # (B, T)
    el = x * attn_w[:, :, None]                                      # (B, T, C)
    mean = jnp.mean(el, axis=1)                                      # (B, C)
    var = jnp.sum(x * el, axis=1) - mean * mean                      # (B, C)
    return jnp.concatenate([mean, var], axis=1)                      # (B, 2C)


if __name__ == "__main__":
    # Small shapes consistent with the module (channel -> C, R_dim_self_att -> E).
    # T = 37 (not a multiple of 8) exercises the padding + in-kernel mask path.
    B, T, C, E = 4, 37, 64, 16

    key = jax.random.PRNGKey(0)
    kx, kw, kb, kv = jax.random.split(key, 4)
    x = jax.random.normal(kx, (B, T, C), dtype=jnp.float32)
    w_proj = 0.1 * jax.random.normal(kw, (E, C), dtype=jnp.float32)   # nn.Linear weight (E, C)
    b_proj = 0.1 * jax.random.normal(kb, (E,), dtype=jnp.float32)     # nn.Linear bias (E,)
    v = jax.random.normal(kv, (E,), dtype=jnp.float32)                # attention vector (E,)

    # f32 path: small caps so the demo exercises multiple batch blocks and
    # multiple time tiles (streaming accumulation + tail masking).
    out = attentive_stat_pool(x, w_proj, b_proj, v,
                              batch_block_cap=2, time_tile_cap=16)
    out = jax.block_until_ready(out)
    ref = reference(x, w_proj, b_proj, v)
    assert out.shape == (B, 2 * C)
    err = float(jnp.max(jnp.abs(out - ref)))
    assert jnp.allclose(out, ref, atol=1e-3, rtol=1e-3), f"f32 mismatch (max abs err {err})"

    # bf16 streaming path (recommended production dtype for this HBM-bound kernel);
    # exercises the single-time-tile + >=2-parallel-batch-block code path.
    x_bf = x.astype(jnp.bfloat16)
    out_bf = jax.block_until_ready(attentive_stat_pool(x_bf, w_proj, b_proj, v))
    ref_bf = reference(x_bf.astype(jnp.float32), w_proj, b_proj, v)
    err_bf = float(jnp.max(jnp.abs(out_bf - ref_bf)))
    assert jnp.allclose(out_bf, ref_bf, atol=2e-3, rtol=2e-3), \
        f"bf16 mismatch (max abs err {err_bf})"

    print("KERNEL_OK")
</pallas_src>

<mosaic_0001>
module attributes {stable_mosaic.version = 11 : i64} {
  func.func @_asp_kernel(%arg0: i32, %arg1: i32, %arg2: memref<2x16x64xf32, #tpu.memory_space<vmem>>, %arg3: memref<1x64xf32, #tpu.memory_space<vmem>>, %arg4: memref<1x1xf32, #tpu.memory_space<vmem>>, %arg5: memref<2x1x128xf32, #tpu.memory_space<vmem>>, %arg6: memref<2x1x1xf32, #tpu.memory_space<vmem>>, %arg7: memref<2x1x64xf32, #tpu.memory_space<vmem>>, %arg8: memref<2x1x64xf32, #tpu.memory_space<vmem>>) attributes {dimension_semantics = [#tpu.dimension_semantics<parallel>, #tpu.dimension_semantics<arbitrary>], iteration_bounds = array<i64: 2, 3>, scalar_prefetch = 0 : i64, scratch_operands = 3 : i64, tpu.core_type = #tpu.core_type<tc>, window_params = [{transform_indices = @transform_0, window_bounds = array<i64: 2, 16, 64>}, {pipeline_mode = #tpu.pipeline_mode<synchronous>, transform_indices = @transform_1, window_bounds = array<i64: 1, 64>}, {pipeline_mode = #tpu.pipeline_mode<synchronous>, transform_indices = @transform_2, window_bounds = array<i64: 1, 1>}, {transform_indices = @transform_3, window_bounds = array<i64: 2, 1, 128>}]} {
    %c0_i32 = arith.constant 0 : i32
    %0 = arith.cmpi eq, %arg1, %c0_i32 : i32
    %1 = arith.extui %0 : i1 to i32
    %c0_i32_0 = arith.constant 0 : i32
    %2 = arith.cmpi ne, %1, %c0_i32_0 : i32
    scf.if %2 {
      %cst_30 = arith.constant 0.000000e+00 : f32
      %45 = vector.broadcast %cst_30 : f32 to vector<2x1x1xf32>
      %c0_31 = arith.constant 0 : index
      %c0_32 = arith.constant 0 : index
      %c0_33 = arith.constant 0 : index
      %46 = vector.load %arg6[%c0_31, %c0_32, %c0_33] : memref<2x1x1xf32, #tpu.memory_space<vmem>>, vector<2x1x1xf32>
      tpu.vector_store %arg6[%c0_31, %c0_32, %c0_33], %45 {strides = array<i32>} : memref<2x1x1xf32, #tpu.memory_space<vmem>>, vector<2x1x1xf32>,
      %cst_34 = arith.constant 0.000000e+00 : f32
      %47 = vector.broadcast %cst_34 : f32 to vector<2x1x64xf32>
      %c0_35 = arith.constant 0 : index
      %c0_36 = arith.constant 0 : index
      %c0_37 = arith.constant 0 : index
      %48 = vector.load %arg7[%c0_35, %c0_36, %c0_37] : memref<2x1x64xf32, #tpu.memory_space<vmem>>, vector<2x1x64xf32>
      tpu.vector_store %arg7[%c0_35, %c0_36, %c0_37], %47 {strides = array<i32>} : memref<2x1x64xf32, #tpu.memory_space<vmem>>, vector<2x1x64xf32>,
      %cst_38 = arith.constant 0.000000e+00 : f32
      %49 = vector.broadcast %cst_38 : f32 to vector<2x1x64xf32>
      %c0_39 = arith.constant 0 : index
      %c0_40 = arith.constant 0 : index
      %c0_41 = arith.constant 0 : index
      %50 = vector.load %arg8[%c0_39, %c0_40, %c0_41] : memref<2x1x64xf32, #tpu.memory_space<vmem>>, vector<2x1x64xf32>
      tpu.vector_store %arg8[%c0_39, %c0_40, %c0_41], %49 {strides = array<i32>} : memref<2x1x64xf32, #tpu.memory_space<vmem>>, vector<2x1x64xf32>,
    } else {
    }
    %c0 = arith.constant 0 : index
    %c0_1 = arith.constant 0 : index
    %c0_2 = arith.constant 0 : index
    %3 = vector.load %arg2[%c0, %c0_1, %c0_2] : memref<2x16x64xf32, #tpu.memory_space<vmem>>, vector<2x16x64xf32>
    %c0_3 = arith.constant 0 : index
    %c0_4 = arith.constant 0 : index
    %4 = vector.load %arg3[%c0_3, %c0_4] : memref<1x64xf32, #tpu.memory_space<vmem>>, vector<1x64xf32>
    %c0_5 = arith.constant 0 : index
    %c0_6 = arith.constant 0 : index
    %5 = vector.load %arg4[%c0_5, %c0_6] : memref<1x1xf32, #tpu.memory_space<vmem>>, vector<1x1xf32>
    %6 = vector.shape_cast %4 : vector<1x64xf32> to vector<1x1x64xf32>
    %7 = vector.broadcast %6 : vector<1x1x64xf32> to vector<2x16x64xf32>
    %8 = arith.mulf %3, %7 : vector<2x16x64xf32>
    %cst = arith.constant dense<0.000000e+00> : vector<2x16xf32>
    %9 = vector.multi_reduction <add>, %8, %cst [2] : vector<2x16x64xf32> to vector<2x16xf32>
    %10 = vector.shape_cast %9 : vector<2x16xf32> to vector<2x16x1xf32>
    %11 = vector.shape_cast %5 : vector<1x1xf32> to vector<1x1x1xf32>
    %12 = vector.broadcast %11 : vector<1x1x1xf32> to vector<2x16x1xf32>
    %13 = arith.addf %10, %12 : vector<2x16x1xf32>
    %14 = math.tanh %13 : vector<2x16x1xf32>
    %15 = math.exp %14 : vector<2x16x1xf32>
    %c16_i32 = arith.constant 16 : i32
    %16 = arith.muli %arg1, %c16_i32 : i32
    %17 = tpu.iota {dimensions = array<i32: 1>} : vector<2x16x1xi32>
    %18 = vector.broadcast %16 : i32 to vector<2x16x1xi32>
    %19 = arith.addi %18, %17 : vector<2x16x1xi32>
    %c37_i32 = arith.constant 37 : i32
    %20 = vector.broadcast %c37_i32 : i32 to vector<2x16x1xi32>
    %21 = arith.cmpi slt, %19, %20 : vector<2x16x1xi32>
    %cst_7 = arith.constant 0.000000e+00 : f32
    %22 = vector.broadcast %cst_7 : f32 to vector<2x16x1xf32>
    %23 = arith.select %21, %15, %22 : vector<2x16x1xi1>, vector<2x16x1xf32>
    %24 = vector.broadcast %23 : vector<2x16x1xf32> to vector<2x16x64xf32>
    %25 = arith.mulf %24, %3 : vector<2x16x64xf32>
    %c0_8 = arith.constant 0 : index
    %c0_9 = arith.constant 0 : index
    %c0_10 = arith.constant 0 : index
    %26 = vector.load %arg6[%c0_8, %c0_9, %c0_10] : memref<2x1x1xf32, #tpu.memory_space<vmem>>, vector<2x1x1xf32>
    %cst_11 = arith.constant dense<0.000000e+00> : vector<2x1xf32>
    %27 = vector.multi_reduction <add>, %23, %cst_11 [1] : vector<2x16x1xf32> to vector<2x1xf32>
    %28 = vector.shape_cast %27 : vector<2x1xf32> to vector<2x1x1xf32>
    %29 = arith.addf %26, %28 : vector<2x1x1xf32>
    %c0_12 = arith.constant 0 : index
    %c0_13 = arith.constant 0 : index
    %c0_14 = arith.constant 0 : index
    %30 = vector.load %arg6[%c0_12, %c0_13, %c0_14] : memref<2x1x1xf32, #tpu.memory_space<vmem>>, vector<2x1x1xf32>
    tpu.vector_store %arg6[%c0_12, %c0_13, %c0_14], %29 {strides = array<i32>} : memref<2x1x1xf32, #tpu.memory_space<vmem>>, vector<2x1x1xf32>,
    %c0_15 = arith.constant 0 : index
    %c0_16 = arith.constant 0 : index
    %c0_17 = arith.constant 0 : index
    %31 = vector.load %arg7[%c0_15, %c0_16, %c0_17] : memref<2x1x64xf32, #tpu.memory_space<vmem>>, vector<2x1x64xf32>
    %cst_18 = arith.constant dense<0.000000e+00> : vector<2x64xf32>
    %32 = vector.multi_reduction <add>, %25, %cst_18 [1] : vector<2x16x64xf32> to vector<2x64xf32>
    %33 = vector.shape_cast %32 : vector<2x64xf32> to vector<2x1x64xf32>
    %34 = arith.addf %31, %33 : vector<2x1x64xf32>
    %c0_19 = arith.constant 0 : index
    %c0_20 = arith.constant 0 : index
    %c0_21 = arith.constant 0 : index
    %35 = vector.load %arg7[%c0_19, %c0_20, %c0_21] : memref<2x1x64xf32, #tpu.memory_space<vmem>>, vector<2x1x64xf32>
    tpu.vector_store %arg7[%c0_19, %c0_20, %c0_21], %34 {strides = array<i32>} : memref<2x1x64xf32, #tpu.memory_space<vmem>>, vector<2x1x64xf32>,
    %c0_22 = arith.constant 0 : index
    %c0_23 = arith.constant 0 : index
    %c0_24 = arith.constant 0 : index
    %36 = vector.load %arg8[%c0_22, %c0_23, %c0_24] : memref<2x1x64xf32, #tpu.memory_space<vmem>>, vector<2x1x64xf32>
    %37 = arith.mulf %25, %3 : vector<2x16x64xf32>
    %cst_25 = arith.constant dense<0.000000e+00> : vector<2x64xf32>
    %38 = vector.multi_reduction <add>, %37, %cst_25 [1] : vector<2x16x64xf32> to vector<2x64xf32>
    %39 = vector.shape_cast %38 : vector<2x64xf32> to vector<2x1x64xf32>
    %40 = arith.addf %36, %39 : vector<2x1x64xf32>
    %c0_26 = arith.constant 0 : index
    %c0_27 = arith.constant 0 : index
    %c0_28 = arith.constant 0 : index
    %41 = vector.load %arg8[%c0_26, %c0_27, %c0_28] : memref<2x1x64xf32, #tpu.memory_space<vmem>>, vector<2x1x64xf32>
    tpu.vector_store %arg8[%c0_26, %c0_27, %c0_28], %40 {strides = array<i32>} : memref<2x1x64xf32, #tpu.memory_space<vmem>>, vector<2x1x64xf32>,
    %c2_i32 = arith.constant 2 : i32
    %42 = arith.cmpi eq, %arg1, %c2_i32 : i32
    %43 = arith.extui %42 : i1 to i32
    %c0_i32_29 = arith.constant 0 : i32
    %44 = arith.cmpi ne, %43, %c0_i32_29 : i32
    scf.if %44 {
      %c0_30 = arith.constant 0 : index
      %c0_31 = arith.constant 0 : index
      %c0_32 = arith.constant 0 : index
      %45 = vector.load %arg6[%c0_30, %c0_31, %c0_32] : memref<2x1x1xf32, #tpu.memory_space<vmem>>, vector<2x1x1xf32>
      %cst_33 = arith.constant 1.000000e+00 : f32
      %46 = vector.broadcast %cst_33 : f32 to vector<2x1x1xf32>
      %47 = arith.divf %46, %45 : vector<2x1x1xf32>
      %c0_34 = arith.constant 0 : index
      %c0_35 = arith.constant 0 : index
      %c0_36 = arith.constant 0 : index
      %48 = vector.load %arg7[%c0_34, %c0_35, %c0_36] : memref<2x1x64xf32, #tpu.memory_space<vmem>>, vector<2x1x64xf32>
      %cst_37 = arith.constant 0.0270270277 : f32
      %49 = vector.broadcast %cst_37 : f32 to vector<2x1x1xf32>
      %50 = arith.mulf %47, %49 : vector<2x1x1xf32>
      %51 = vector.broadcast %50 : vector<2x1x1xf32> to vector<2x1x64xf32>
      %52 = arith.mulf %48, %51 : vector<2x1x64xf32>
      %c0_38 = arith.constant 0 : index
      %c0_39 = arith.constant 0 : index
      %c0_40 = arith.constant 0 : index
      %53 = vector.load %arg8[%c0_38, %c0_39, %c0_40] : memref<2x1x64xf32, #tpu.memory_space<vmem>>, vector<2x1x64xf32>
      %54 = vector.broadcast %47 : vector<2x1x1xf32> to vector<2x1x64xf32>
      %55 = arith.mulf %53, %54 : vector<2x1x64xf32>
      %56 = arith.mulf %52, %52 : vector<2x1x64xf32>
      %57 = arith.subf %55, %56 : vector<2x1x64xf32>
      %c0_41 = arith.constant 0 : index
      %c0_42 = arith.constant 0 : index
      %c0_43 = arith.constant 0 : index
      %58 = vector.load %arg5[%c0_41, %c0_42, %c0_43] : memref<2x1x128xf32, #tpu.memory_space<vmem>>, vector<2x1x64xf32>
      tpu.vector_store %arg5[%c0_41, %c0_42, %c0_43], %52 {strides = array<i32>} : memref<2x1x128xf32, #tpu.memory_space<vmem>>, vector<2x1x64xf32>,
      %c0_44 = arith.constant 0 : index
      %c0_45 = arith.constant 0 : index
      %c64 = arith.constant 64 : index
      %59 = vector.load %arg5[%c0_44, %c0_45, %c64] : memref<2x1x128xf32, #tpu.memory_space<vmem>>, vector<2x1x64xf32>
      tpu.vector_store %arg5[%c0_44, %c0_45, %c64], %57 {strides = array<i32>} : memref<2x1x128xf32, #tpu.memory_space<vmem>>, vector<2x1x64xf32>,
    } else {
    }
    return
  }
  func.func @transform_0(%arg0: i32, %arg1: i32) -> (i32, i32, i32) {
    %c0_i32 = arith.constant 0 : i32
    %c0_i32_0 = arith.constant 0 : i32
    return %arg0, %arg1, %c0_i32 : i32, i32, i32
  }
  func.func @transform_1(%arg0: i32, %arg1: i32) -> (i32, i32) {
    %c0_i32 = arith.constant 0 : i32
    %c0_i32_0 = arith.constant 0 : i32
    %c0_i32_1 = arith.constant 0 : i32
    return %c0_i32, %c0_i32_0 : i32, i32
  }
  func.func @transform_2(%arg0: i32, %arg1: i32) -> (i32, i32) {
    %c0_i32 = arith.constant 0 : i32
    %c0_i32_0 = arith.constant 0 : i32
    %c0_i32_1 = arith.constant 0 : i32
    return %c0_i32, %c0_i32_0 : i32, i32
  }
  func.func @transform_3(%arg0: i32, %arg1: i32) -> (i32, i32, i32) {
    %c0_i32 = arith.constant 0 : i32
    %c0_i32_0 = arith.constant 0 : i32
    %c0_i32_1 = arith.constant 0 : i32
    return %arg0, %c0_i32, %c0_i32_0 : i32, i32, i32
  }
}

</mosaic_0001>

<bundles_post_ra>
// kernel: tpu_custom_call.1
= control target key start
LH: loop header
LB: loop body
LE: loop exit
PB: predicated region body
PF: predicated region fallthrough
CT: control target
= control target key end

     0   :  { %s1178_s0 = inlined_call_operand.hbm [shape: f32[4,48,64], index: 0, kind: input, shape index: {}]   ;;  %s1179_s1 = inlined_call_operand.vmem [shape: f32[1,64], index: 1, kind: input, shape index: {}]   ;;  %s1180_s2 = inlined_call_operand.<no memory space> [shape: f32[1,1], index: 2, kind: input, shape index: {}]   ;;  %s1181_s3 = inlined_call_operand.hbm [shape: f32[4,1,128], index: 3, kind: output, shape index: {}]  }
   0x1   :  { %v8_v0 = vstv %s1180_s2 }
   0x2   :  { %9 = vst [vmem:[#allocation5] sm:$0x1] %v8_v0 }
   0x3   :  { %10 = vsyncpa [#allocation7], 0 }
   0x4   :  { %12 = vsyncpa [#allocation7 + $0x1], 0 }
   0x5   :  { %13 = vsyncpa [#allocation8], 0 }
   0x6   :  { %15 = vsyncpa [#allocation8 + $0x1], 0  ;;  %s921_s14 = smov 0   ;;  %s923_s15 = smov 0  }
   0x7   :  { %s925_s16 = smov 0   ;;  %s927_s17 = smov 0  }
   0x8   :  { %s929_s18 = smov 0   ;;  %s931_s19 = smov 0  }
   0x9   :  { %s933_s20 = smov 0   ;;  %s935_s2 = smov 0  }
   0xa   :  { %s937_s21 = smov 0   ;;  %s939_s22 = smov 0  }
   0xb   :  { %s941_s23 = smov 0  }
   0xc LB: > { %1187 = sst [smem:[#allocation15_spill]] %s863_s19  ;;  %s597_s24 = sadd.s32 4294967295, %s883_s23   ;;  %s883_s23 = sphi %s941_s23, %s21_s23   ;;  %s879_s22 = sphi %s939_s22, %s1202_s22   ;;  %s875_s21 = sphi %s937_s21, %s1201_s21   ;;  %s871_s2 = sphi %s935_s2, %s1200_s2   ;;  %s867_s20 = sphi %s933_s20, %s1199_s20   ;;  %s863_s19 = sphi %s931_s19, %s1198_s19   ;;  %s859_s18 = sphi %s929_s18, %s1207_s18   ;;  %s855_s17 = sphi %s927_s17, %s1206_s17   ;;  %s851_s16 = sphi %s925_s16, %s1205_s16   ;;  %s847_s15 = sphi %s923_s15, %s1204_s15   ;;  %s843_s14 = sphi %s921_s14, %s1203_s14  }
   0xd   : > { %1188 = sst [smem:[#allocation16_spill]] %s875_s21  ;;  %s598_s25 = sadd.s32 4294967294, %s883_s23  }
   0xe   : > { %1189 = sst [smem:[#allocation17_spill]] %s879_s22  ;;  %s30_s26 = sadd.s32 1, %s875_s21 }
   0xf   : > { %s33_s27 = sadd.s32 1, %s879_s22  ;;  %p31_p0 = scmp.ge.s32.totalorder %s30_s26, 3 }
  0x10   : > { %s42_s28 = sadd.s32 1, %s863_s19  ;;  %p49_p1 = scmp.ne.s32.totalorder %s863_s19, %s859_s18 }
  0x11   : > { %p50_p2 = scmp.eq.s32.totalorder %s883_s23, 0  ;;  %s1209_s26 = smov (%p31_p0, %s30_s26), 0 }
  0x12   : > { %1190 = sst [smem:[#allocation18_spill]] %s1209_s26  ;;  %s1211_s27 = smov (!%p31_p0, %s33_s27), %s879_s22 }
  0x13   : > { %s38_s29 = ssub.s32 %s875_s21, %s1209_s26  ;;  %p987_p3 = por %p50_p2, %p49_p1 }
  0x14   : > { %p35_p4 = scmp.ge.s32.totalorder %s1211_s27, 2  ;;  %p55_p5 = scmp.ne.s32.totalorder %s859_s18, %s855_s17 }
  0x15   : > { %p56_p6 = scmp.eq.s32.totalorder %s597_s24, 0  ;;  %s110_s4 = sadd.s32 1, %s851_s16 }
  0x16   : > { %s1213_s27 = smov (%p35_p4, %s1211_s27), 0  ;;  %p120_p8 = scmp.ne.s32.totalorder %s851_s16, %s847_s15 }
  0x17   : > { %1192 = sst [smem:[#allocation19_spill]] %s1213_s27  ;;  %p995_p7 = por %p56_p6, %p55_p5 }
  0x18   : > { %s37_s6 = ssub.s32 %s879_s22, %s1213_s27  ;;  %p121_p9 = scmp.eq.s32.totalorder %s597_s24, 5 }
  0x19   : > { %s39_s7 = sor.u32 %s38_s29, %s37_s6  ;;  %p108_p10 = scmp.eq.s32.totalorder %s37_s6, 0 }
  0x1a   : > { %p40_p11 = scmp.eq.s32.totalorder %s39_s7, 0  ;;  %p1003_p12 = por %p121_p9, %p120_p8 }
  0x1b   : > { %s1008_s9 = scalar_select %p108_p10, %s851_s16, %s110_s4  }
  0x1c   : > { %s1011_s10 = scalar_select %p40_p11, %s863_s19, %s42_s28  }
  0x1d   : > { %p126_p13 = scmp.ne.s32.totalorder %s847_s15, %s843_s14  ;;  %p127_p0 = scmp.eq.s32.totalorder %s598_s25, 5 }
  0x1e   : > { %1195 = sst [smem:[#allocation20_spill]] %s1011_s10  ;;  %p600_p2 = scmp.ge.s32.totalorder %s883_s23, 6 }
  0x1f   : > { %p1015_p1 = por %p127_p0, %p126_p13 }
  0x20   : > { %149 = sbr.rel (%p600_p2) target bundleno = 52 (0x34), region = 24 }
  0x25   : > { %s153_s12 = sand.u32 1, %s863_s19   ;;  %s603_s13 = sshll.u32 %s875_s21, 1 }
  0x26   : > { %s601_s17 = sshll.u32 %s153_s12, 5  ;;  %s622_s24 = smul.u32 12, %s879_s22 }
  0x27   : > { %s623_s25 = scalar_select %p987_p3, [#allocation0], [#allocation12] }
  0x28   : > { %s164_s28 = sadd.s32 %s622_s24, %s603_s13  ;;  %s157_s29 = scalar_lea.vmem [#allocation6], %s601_s17 }
  0x29   : > { %s179_s4 = sshll.u32 %s157_s29, 4  ;;  %s605_s6 = sshll.u32 %s164_s28, 7  ;;  %s180_s4 = int_to_ptr.vmem [resolvable:$true] %s179_s4 }
  0x2a   : > { %s171_s7 = sld [smem:[%s623_s25]]   ;;  %s166_s10 = scalar_lea.hbm %s1178_s0, %s605_s6 }
  0x2b   : > { %s885_s21 = smov 768   ;;  %s886_s22 = smov 256  }
  0x2c   : > { %624 = sst [smem:[#allocation11]] (%p987_p3), %s885_s21  ;;  %s887_s19 = smov 2  }
  0x2d   : > { %625 = sst [smem:[#allocation11 + $0x1]] (%p987_p3), %s886_s22  ;;  %s888_s17 = smov 128  }
  0x2e   : > { %626 = sst [smem:[#allocation11 + $0x2]] (%p987_p3), %s887_s19  ;;  %s889_s26 = smov 8  }
  0x2f   : > { %627 = sst [smem:[#allocation11 + $0x3]] (%p987_p3), %s888_s17  ;;  %s154_s27 = scalar_lea.sflag [#allocation7], %s153_s12 }
  0x30   : > { %s606_s13 = sshll.u32 %s171_s7, 26  ;;  %628 = sst [smem:[#allocation11 + $0x4]] (%p987_p3), %s888_s17 }
  0x31   : > { %s607_s24 = sadd.s32 134217728, %s606_s13  ;;  %629 = sst [smem:[#allocation11 + $0x5]] (%p987_p3), %s889_s26 }
  0x32   : > { %s890_s25 = smov 131072  }
  0x33   : > { %630 = dma.general (%p987_p3), %s166_s10, 512, %s180_s4, %s154_s27, %s890_s25, [#allocation11], %s607_s24, 0  }
  0x34 PF: > { %p608_p4 = scmp.ge.s32.totalorder %s883_s23, 1  ;;  %p200_p5 = scmp.lt.s32.totalorder %s883_s23, 7 }
  0x36   : > { %p201_p6 = pnand %p608_p4, %p200_p5 }
  0x37   : > { %s206_s19 = sand.u32 (!%p201_p6), 1, %s859_s18  }
  0x38   : > { %204 = sbr.rel (%p201_p6) target bundleno = 702 (0x2be), region = 32  ;;  %s609_s21 = sshll.u32 (!%p201_p6), %s206_s19, 5 }
  0x39   : > { %s207_s22 = scalar_lea.sflag (!%p201_p6), [#allocation7], %s206_s19  ;;  %s210_s28 = scalar_lea.vmem (!%p201_p6), [#allocation6], %s609_s21 }
  0x3d   : > { %834 = dma.done.wait (%p995_p7), %s207_s22, 512  }
  0x3e   : > { %836 = vsyncadd (%p995_p7), %s207_s22, 4294966784  ;;  %s230_s30 = sand.u32 1, %s847_s15   ;;  %p611_p3 = scmp.ne.s32.totalorder %s867_s20, 0 }
  0x3f   : > { %s610_s10 = sshll.u32 %s230_s30, 1 }
  0x40   : > { %s1052_s12 = scalar_lea.vmem [#allocation9], %s610_s10  ;;  %239 = sbr.rel (%p611_p3) target bundleno = 73 (0x49), region = 40 }
  0x45   : > { %vm240_vm0 = vcmask 0   ;;  %vm243_vm1 = vcmask 516096   ;;  %v891_v1 = vmov 0.0  }
  0x46   : > { %241 = vst.msk [vmem:[#allocation2] sm:$0x1] %vm240_vm0, %v891_v1  ;;  %242 = vst.msk [vmem:[#allocation2 + $0x1] sm:$0x1] %vm240_vm0, %v891_v1 }
  0x47   : > { %244 = vst.msk [vmem:[#allocation3] sm:$0x1] %vm243_vm1, %v891_v1  ;;  %245 = vst.msk [vmem:[#allocation3 + $0x1] sm:$0x1] %vm243_vm1, %v891_v1 }
  0x48   : > { %246 = vst.msk [vmem:[#allocation4] sm:$0x1] %vm243_vm1, %v891_v1  ;;  %247 = vst.msk [vmem:[#allocation4 + $0x1] sm:$0x1] %vm243_vm1, %v891_v1 }
  0x49 PF: > { %v1055_v2 = vld [vmem:[%s210_s28 + $0x10] sm:$0xff]  ;;  %v612_v3 = vld [vmem:[%s1179_s1] ss:$0 sm:$0xff]  ;;  %vm264_vm2 = vcmask 523264   ;;  %v1060_v4 = vld [vmem:[%s210_s28] sm:$0xff]  ;;  %v892_v15 = vmov 0   ;;  %v300_v29 = vlaneseq }
  0x4a   : > { %v262_v5 = vmul.f32 %v612_v3, %v1055_v2  ;;  %v260_v6 = vmul.f32 %v612_v3, %v1060_v4  ;;  %v1064_v7 = vld [vmem:[%s210_s28 + $0x18] sm:$0xff]  ;;  %v1066_v8 = vld [vmem:[%s210_s28 + $0x8] sm:$0xff]  ;;  %739 = vset.pattern.permute.xlu0 %v892_v15  ;;  %740 = vset.pattern.permute.xlu1 %v892_v15  ;;  %s614_s4 = sshll.u32 %s867_s20, 4  ;;  %vm338_vm5 = vcmask 7168   ;;  %vm359_vm6 = vcmask 0   ;;  %p615_p7 = scmp.ne.s32.totalorder %s867_s20, 2 }
  0x4b   : > { %v263_v9 = vmul.f32 %v612_v3, %v1064_v7  ;;  %v261_v10 = vmul.f32 %v612_v3, %v1066_v8  ;;  %v613_v16 = vld [vmem:[#allocation5] ss:$0 sm:$0xff]  ;;  %v1075_v34 = vshrl.u32 %v300_v29, 7  ;;  %v303_v35 = vstv %s614_s4  ;;  %s894_s20 = smov (!%p615_p7), 64  }
  0x4c   : > { %v271_v11 = vsel %vm264_vm2, %v262_v5, 0.0  ;;  %v265_v12 = vsel %vm264_vm2, %v260_v6, 0.0  ;;  %vm384_vm7 = vcmask 516096  }
  0x4d   : > { %272 = vadd.xlane.f32.xlu1 %v271_v11  ;;  %266 = vadd.xlane.f32.xlu0 %v265_v12  ;;  %v274_v13 = vsel %vm264_vm2, %v263_v9, 0.0  ;;  %v268_v14 = vsel %vm264_vm2, %v261_v10, 0.0  ;;  %v302_v36 = vadd.s32 8, %v1075_v34  ;;  %v304_v37 = vadd.s32 %v303_v35, %v1075_v34  ;;  %v337_v63 = vld [vmem:[#allocation2 + $0x1] sm:$0x1] }
  0x4e   : > { %v336_v0 = vld [vmem:[#allocation2] sm:$0x1] }
  0x4f   : > { %v305_v38 = vadd.s32 %v303_v35, %v302_v36  ;;  %vm306_vm3 = vcmp.lt.s32.totalorder %v304_v37, 37 }
  0x51   : > { %275 = vadd.xlane.f32.xlu1 %v274_v13  ;;  %269 = vadd.xlane.f32.xlu0 %v268_v14  ;;  %vm307_vm4 = vcmp.lt.s32.totalorder %v305_v38, 37 }
  0xd6   : > { %v273_v17 = vpop.xlane.xlu1 %272  ;;  %v267_v18 = vpop.xlane.xlu0 %266 }
  0xd7   : > { %v285_v19 = vadd.f32 %v613_v16, %v273_v17  ;;  %v283_v20 = vadd.f32 %v613_v16, %v267_v18 }
  0xd9   : > { %741 = vtanh.f32 %v285_v19 }
  0xda   : > { %743 = vtanh.f32 %v283_v20  ;;  %v276_v21 = vpop.xlane.xlu1 %275  ;;  %v270_v22 = vpop.xlane.xlu0 %269 }
  0xdb   : > { %v286_v23 = vadd.f32 %v613_v16, %v276_v21  ;;  %v284_v24 = vadd.f32 %v613_v16, %v270_v22 }
  0xdd   : > { %745 = vtanh.f32 %v286_v23 }
  0xde   : > { %747 = vtanh.f32 %v284_v24 }
  0xe6   : > { %v742_v25 = vpop.eup %741 }
  0xe7   : > { %v744_v26 = vpop.eup %743  ;;  %v295_v27 = vmul.f32 1.442695, %v742_v25 }
  0xe8   : > { %v291_v28 = vmul.f32 1.442695, %v744_v26 }
  0xe9   : > { %749 = vpow2.f32 %v295_v27 }
  0xea   : > { %v746_v30 = vpop.eup %745  ;;  %751 = vpow2.f32 %v291_v28 }
  0xeb   : > { %v748_v31 = vpop.eup %747  ;;  %v297_v32 = vmul.f32 1.442695, %v746_v30 }
  0xec   : > { %v293_v33 = vmul.f32 1.442695, %v748_v31 }
  0xed   : > { %753 = vpow2.f32 %v297_v32 }
  0xee   : > { %755 = vpow2.f32 %v293_v33 }
  0xf6   : > { %v750_v39 = vpop.eup %749 }
  0xf7   : > { %v752_v40 = vpop.eup %751  ;;  %v310_v41 = vsel %vm306_vm3, %v750_v39, 0.0 }
  0xf8   : > { %v308_v42 = vsel %vm306_vm3, %v752_v40, 0.0  ;;  %v348_v44 = vsel %vm338_vm5, %v310_v41, 0.0 }
  0xf9   : > { %314 = vperm.xlu0 %739, %v308_v42   ;;  %v339_v49 = vsel %vm338_vm5, %v308_v42, 0.0 }
  0xfa   : > { %v754_v43 = vpop.eup %753 }
  0xfb   : > { %v756_v45 = vpop.eup %755  ;;  %v311_v46 = vsel %vm307_vm4, %v754_v43, 0.0 }
  0xfc   : > { %v309_v47 = vsel %vm307_vm4, %v756_v45, 0.0  ;;  %v349_v48 = vsel %vm338_vm5, %v311_v46, 0.0 }
  0xfd   : > { %319 = vperm.xlu1 %740, %v309_v47   ;;  %v340_v50 = vsel %vm338_vm5, %v309_v47, 0.0  ;;  %v350_v51 = vadd.f32 %v349_v48, %v348_v44 }
  0xfe   : > { %v341_v52 = vadd.f32 %v340_v50, %v339_v49 }
  0xff   : > { %v351_v53 = vrot.slane %v350_v51, 4 }
 0x100   : > { %v342_v54 = vrot.slane %v341_v52, 4 }
 0x101   : > { %324 = vperm.xlu1 %740, %v310_v41   ;;  %v352_v55 = vadd.f32 %v351_v53, %v350_v51  ;;  %v362_v41 = vld [vmem:[#allocation3] sm:$0x1] }
 0x102   : > { %v343_v56 = vadd.f32 %v342_v54, %v341_v52 }
 0x103   : > { %v353_v57 = vrot.slane %v352_v55, 2 }
 0x104   : > { %v344_v58 = vrot.slane %v343_v56, 2 }
 0x105   : > { %v354_v59 = vadd.f32 %v353_v57, %v352_v55  ;;  %329 = vperm.xlu1 %740, %v311_v46   ;;  %v387_v46 = vld [vmem:[#allocation4] sm:$0x1]  ;;  %v363_v55 = vld [vmem:[#allocation3 + $0x1] sm:$0x1] }
 0x106   : > { %v345_v60 = vadd.f32 %v344_v58, %v343_v56  ;;  %v388_v58 = vld [vmem:[#allocation4 + $0x1] sm:$0x1] }
 0x107   : > { %v355_v61 = vrot.slane %v354_v59, 1 }
 0x108   : > { %v346_v62 = vrot.slane %v345_v60, 1 }
 0x109   : > { %v356_v1 = vadd.f32 %v355_v61, %v354_v59 }
 0x10a   : > { %v347_v3 = vadd.f32 %v346_v62, %v345_v60 }
 0x10b   : > { %v358_v5 = vadd.f32 %v356_v1, %v337_v63 }
 0x10c   : > { %v357_v6 = vadd.f32 %v347_v3, %v336_v0 }
 0x10d   : > { %361 = vst.msk [vmem:[#allocation2 + $0x1] sm:$0x1] %vm359_vm6, %v358_v5 }
 0x10e   : > { %360 = vst.msk [vmem:[#allocation2] sm:$0x1] %vm359_vm6, %v357_v6 }
 0x174   : > { %v315_v9 = vpop.permute.xlu0 %314 }
 0x175   : > { %v332_v10 = vmul.f32 %v315_v9, %v1060_v4 }
 0x177   : > { %v389_v12 = vmul.f32 %v332_v10, %v1060_v4  ;;  %v364_v14 = vsel %vm264_vm2, %v332_v10, 0.0 }
 0x178   : > { %v320_v11 = vpop.permute.xlu1 %319 }
 0x179   : > { %v333_v13 = vmul.f32 %v320_v11, %v1066_v8  ;;  %v393_v19 = vsel %vm264_vm2, %v389_v12, 0.0 }
 0x17b   : > { %v365_v15 = vsel %vm264_vm2, %v333_v13, 0.0  ;;  %v390_v16 = vmul.f32 %v333_v13, %v1066_v8 }
 0x17c   : > { %v366_v17 = vadd.f32 %v365_v15, %v364_v14  ;;  %v325_v18 = vpop.permute.xlu1 %324 }
 0x17d   : > { %v394_v20 = vsel %vm264_vm2, %v390_v16, 0.0  ;;  %v334_v21 = vmul.f32 %v325_v18, %v1055_v2 }
 0x17e   : > { %v367_v22 = vrot.slane %v366_v17, 4  ;;  %v395_v23 = vadd.f32 %v394_v20, %v393_v19 }
 0x17f   : > { %v391_v26 = vmul.f32 %v334_v21, %v1055_v2  ;;  %v373_v8 = vsel %vm264_vm2, %v334_v21, 0.0 }
 0x180   : > { %v368_v24 = vadd.f32 %v367_v22, %v366_v17  ;;  %v396_v4 = vrot.slane %v395_v23, 4  ;;  %v330_v25 = vpop.permute.xlu1 %329 }
 0x181   : > { %v335_v27 = vmul.f32 %v330_v25, %v1064_v7  ;;  %v402_v36 = vsel %vm264_vm2, %v391_v26, 0.0 }
 0x182   : > { %v369_v28 = vrot.slane %v368_v24, 2  ;;  %v397_v29 = vadd.f32 %v396_v4, %v395_v23 }
 0x183   : > { %v374_v30 = vsel %vm264_vm2, %v335_v27, 0.0  ;;  %v392_v31 = vmul.f32 %v335_v27, %v1064_v7 }
 0x184   : > { %v370_v32 = vadd.f32 %v369_v28, %v368_v24  ;;  %v398_v33 = vrot.slane %v397_v29, 2  ;;  %v375_v35 = vadd.f32 %v374_v30, %v373_v8 }
 0x185   : > { %v403_v37 = vsel %vm264_vm2, %v392_v31, 0.0 }
 0x186   : > { %v371_v38 = vrot.slane %v370_v32, 1  ;;  %v399_v39 = vadd.f32 %v398_v33, %v397_v29  ;;  %v376_v2 = vrot.slane %v375_v35, 4  ;;  %v404_v40 = vadd.f32 %v403_v37, %v402_v36 }
 0x188   : > { %v372_v42 = vadd.f32 %v371_v38, %v370_v32  ;;  %v400_v43 = vrot.slane %v399_v39, 1  ;;  %v377_v44 = vadd.f32 %v376_v2, %v375_v35  ;;  %v405_v45 = vrot.slane %v404_v40, 4 }
 0x18a   : > { %v382_v47 = vadd.f32 %v372_v42, %v362_v41  ;;  %v401_v7 = vadd.f32 %v400_v43, %v399_v39  ;;  %v378_v48 = vrot.slane %v377_v44, 2  ;;  %v406_v49 = vadd.f32 %v405_v45, %v404_v40 }
 0x18c   : > { %385 = vst.msk [vmem:[#allocation3] sm:$0x1] %vm384_vm7, %v382_v47  ;;  %v411_v50 = vadd.f32 %v401_v7, %v387_v46  ;;  %v379_v51 = vadd.f32 %v378_v48, %v377_v44  ;;  %v407_v52 = vrot.slane %v406_v49, 2 }
 0x18e   : > { %413 = vst.msk [vmem:[#allocation4] sm:$0x1] %vm384_vm7, %v411_v50  ;;  %v380_v53 = vrot.slane %v379_v51, 1  ;;  %v408_v54 = vadd.f32 %v407_v52, %v406_v49 }
 0x190   : > { %v381_v56 = vadd.f32 %v380_v53, %v379_v51  ;;  %v409_v57 = vrot.slane %v408_v54, 1 }
 0x192   : > { %v383_v59 = vadd.f32 %v381_v56, %v363_v55  ;;  %v410_v60 = vadd.f32 %v409_v57, %v408_v54  ;;  %418 = sbr.rel (%p615_p7) target bundleno = 678 (0x2a6), region = 44 }
 0x194   : > { %386 = vst.msk [vmem:[#allocation3 + $0x1] sm:$0x1] %vm384_vm7, %v383_v59  ;;  %v412_v61 = vadd.f32 %v410_v60, %v388_v58 }
 0x196   : > { %414 = vst.msk [vmem:[#allocation4 + $0x1] sm:$0x1] %vm384_vm7, %v412_v61 }
 0x197   : > { %v419_v62 = vld [vmem:[#allocation2] sm:$0x1]  ;;  %v420_v63 = vld [vmem:[#allocation2 + $0x1] sm:$0x1]  ;;  %v893_v0 = vmov 0   ;;  %v436_v9 = vsub.s32 0, %v1075_v34 }
 0x198   : > { %758 = vset.pattern.permute.xlu1 %v893_v0  ;;  %759 = vrcp.f32 %v419_v62  ;;  %757 = vset.pattern.permute.xlu0 %v893_v0  ;;  %v449_v12 = vld [vmem:[#allocation4] sm:$0x1]  ;;  %v425_v13 = vld [vmem:[#allocation3] sm:$0x1]  ;;  %vm493_vm8 = vcmask 1040896  }
 0x199   : > { %761 = vrcp.f32 %v420_v63 }
 0x19b   : > { %v426_v19 = vld [vmem:[#allocation3 + $0x1] sm:$0x1] }
 0x19d   : > { %v450_v24 = vld [vmem:[#allocation4 + $0x1] sm:$0x1] }
 0x1a5   : > { %v760_v1 = vpop.eup %759 }
 0x1a6   : > { %v762_v3 = vpop.eup %761  ;;  %453 = vperm.xlu1 %758, %v760_v1   ;;  %v427_v5 = vmul.f32 0.027027028, %v760_v1 }
 0x1a7   : > { %v428_v6 = vmul.f32 0.027027028, %v762_v3 }
 0x1a8   : > { %431 = vperm.xlu0 %757, %v427_v5  }
 0x1aa   : > { %462 = vperm.xlu1 %758, %v762_v3  }
 0x1ac   : > { %440 = vperm.xlu0 %757, %v428_v6  }
 0x221   : > { %v454_v10 = vpop.permute.xlu1 %453 }
 0x222   : > { %v459_v11 = vrot.slane %v454_v10, %v436_v9 }
 0x223   : > { %v432_v14 = vpop.permute.xlu0 %431 }
 0x224   : > { %v437_v15 = vrot.slane %v432_v14, %v436_v9  ;;  %v469_v17 = vmul.f32 %v459_v11, %v449_v12 }
 0x225   : > { %v463_v16 = vpop.permute.xlu1 %462 }
 0x226   : > { %v447_v18 = vmul.f32 %v437_v15, %v425_v13  ;;  %v468_v22 = vrot.slane %v463_v16, %v436_v9 }
 0x227   : > { %v441_v20 = vpop.permute.xlu0 %440 }
 0x228   : > { %v471_v21 = vmul.f32 %v447_v18, %v447_v18  ;;  %475 = vst.msk [vmem:[%s1052_s12] sm:$0x1] %vm384_vm7, %v447_v18  ;;  %v446_v23 = vrot.slane %v441_v20, %v436_v9  ;;  %v470_v25 = vmul.f32 %v468_v22, %v450_v24 }
 0x22a   : > { %v448_v34 = vmul.f32 %v446_v23, %v426_v19  ;;  %v473_v4 = vsub.f32 %v469_v17, %v471_v21 }
 0x22c   : > { %v472_v26 = vmul.f32 %v448_v34, %v448_v34  ;;  %476 = vst.msk [vmem:[%s1052_s12 + $0x1] sm:$0x1] %vm384_vm7, %v448_v34  ;;  %v482_v27 = vrot.slane %v473_v4, %v436_v9 }
 0x22e   : > { %487 = vrot.lane.b32.xlu0 %v482_v27, %s894_s20  ;;  %v474_v28 = vsub.f32 %v470_v25, %v472_v26 }
 0x230   : > { %v486_v29 = vrot.slane %v474_v28, %v436_v9 }
 0x232   : > { %489 = vrot.lane.b32.xlu1 %v486_v29, %s894_s20 }
 0x2a0   : > { %v488_v8 = vpop.permute.xlu0 %487 }
 0x2a1   : > { %494 = vst.msk [vmem:[%s1052_s12] sm:$0x1] %vm493_vm8, %v488_v8 }
 0x2a4   : > { %v490_v30 = vpop.permute.xlu1 %489 }
 0x2a5   : > { %495 = vst.msk [vmem:[%s1052_s12 + $0x1] sm:$0x1] %vm493_vm8, %v490_v30 }
 0x2a6 PF: > { %s621_s6 = sshll.u32 %s871_s2, 5  ;;  %s510_s24 = sshll.u32 %s1052_s12, 4  ;;  %s1114_s24 = int_to_ptr.vmem [resolvable:$true] %s510_s24 }
 0x2a7   : > { %s1111_s17 = scalar_lea.hbm %s1181_s3, %s621_s6  ;;  %s1118_s26 = scalar_lea.sflag [#allocation8], %s230_s30 }
 0x2a8   : > { %s763_s27 = scalar_lea.vmem %s1114_s24, 32  ;;  %s895_s2 = smov [#allocation9]  }
 0x2a9   : > { %p764_p8 = scmp.ne.s32.totalorder %s1114_s24, %s763_s27  ;;  %s767_s25 = sshll.u32 %s895_s2, 4  ;;  %s768_s25 = int_to_ptr.vmem [resolvable:$false] %s767_s25 }
 0x2aa   : > { %s769_s19 = scalar_lea.vmem %s768_s25, 64  ;;  %p770_p11 = scmp.lt.s32.totalorder %s1114_s24, %s768_s25 }
 0x2ab   : > { %p765_p9 = pnand %p764_p8, %p1003_p12  ;;  %p771_p13 = scmp.lt.s32.totalorder %s769_s19, %s763_s27 }
 0x2ad   : > { %p766_p10 = pneg %p765_p9  ;;  %p772_p0 = por %p771_p13, %p770_p11 }
 0x2af   : > { %p773_p2 = pnand %p772_p0, %p766_p10 }
 0x2b1   : > { %776 = shalt.err (!%p773_p2)
}
 0x2b2   : > { %s777_s21 = scalar_lea.hbm %s1111_s17, 32  ;;  %s781_s30 = scalar_lea.hbm %s1181_s3, 64 }
 0x2b3   : > { %p778_p4 = scmp.ne.s32.totalorder %s1111_s17, %s777_s21  ;;  %p782_p3 = scmp.lt.s32.totalorder %s1111_s17, %s1181_s3 }
 0x2b4   : > { %p783_p7 = scmp.lt.s32.totalorder %s781_s30, %s777_s21 }
 0x2b5   : > { %p779_p5 = pnand %p778_p4, %p1003_p12 }
 0x2b6   : > { %p784_p8 = por %p783_p7, %p782_p3 }
 0x2b7   : > { %p780_p6 = pneg %p779_p5 }
 0x2b9   : > { %p785_p9 = pnand %p784_p8, %p780_p6 }
 0x2bb   : > { %788 = shalt.err (!%p785_p9)
}
 0x2bc   : > { %s896_s5 = smov 16   ;;  %s897_s29 = smov 1  }
 0x2bd   : > { %632 = dma.vmem_to_hbm [thread:$0]  (%p1003_p12), %s1114_s24, 32, %s1111_s17, %s1118_s26, %s896_s5, %s896_s5, %s897_s29  }
 0x2be PF: > { %p638_p10 = scmp.ge.s32.totalorder %s883_s23, 2  ;;  %s525_s4 = sand.u32 1, %s843_s14  }
 0x2bf   : > { %s526_s20 = scalar_lea.sflag [#allocation8], %s525_s4 }
 0x2c0   : > { %p635_p11 = pnand %p638_p10, %p1015_p1 }
 0x2c2   : > { %p636_p13 = pneg %p635_p11 }
 0x2c4   : > { %838 = dma.done.wait (%p636_p13), %s526_s20, 32  }
 0x2c5   : > { %840 = vsyncadd (%p636_p13), %s526_s20, 4294967264  ;;  %s21_s23 = sadd.s32 1, %s883_s23   ;;  %s1197_s8 = sld [smem:[#allocation15_spill]] }
 0x2c6   : > { %p18_p0 = scmp.ge.s32.totalorder %s21_s23, 8   ;;  %s1198_s19 = sld [smem:[#allocation20_spill]] }
 0x2c7   : > { %s1199_s20 = sld [smem:[#allocation16_spill]]  ;;  %s1203_s14 = smov %s847_s15 }
 0x2c8   : > { %s1200_s2 = sld [smem:[#allocation17_spill]]  ;;  %s1204_s15 = smov %s851_s16 }
 0x2c9   : > { %s1201_s21 = sld [smem:[#allocation18_spill]]  ;;  %s1205_s16 = smov %s1008_s9 }
 0x2ca   : > { %s1202_s22 = sld [smem:[#allocation19_spill]]  ;;  %s1206_s17 = smov %s859_s18 }
 0x2cb   : > { %s1207_s18 = smov %s1197_s8  ;;  %20 = sbr.rel (!%p18_p0) target bundleno = 12 (0xc), region = 90 }
 0x2d0   :  { %531 = vsyncpa [#allocation7], 1 }
 0x2d1   :  { %533 = vsyncpa [#allocation7 + $0x1], 1 }
 0x2d2   :  { %534 = vsyncpa [#allocation8], 1 }
 0x2d3   :  { %536 = vsyncpa [#allocation8 + $0x1], 1 }

</bundles_post_ra>
